<compile_context>
chip_gen: v7x
topology: tpu7x:2x2x1
jax: 0.10.0
libtpu: 0.0.40
codegen_flags: <defaults>
</compile_context>

<pallas_src>
import functools
import math

import jax
import jax.numpy as jnp
from jax.experimental import pallas as pl
from jax.experimental.pallas import tpu as pltpu


# --------------------------- VMEM-aware tile sizing ---------------------------
def _vmem_capacity_bytes():
    try:
        info = pltpu.get_tpu_info()
        return int(getattr(info, "vmem_capacity_bytes", 64 * 1024 * 1024))
    except Exception:
        return 64 * 1024 * 1024          # conservative default (v7x per-core)


_VMEM_CAP = _vmem_capacity_bytes()
# Scoped limit handed to Mosaic (headroom below physical VMEM: 32 MiB on v7x,
# 64 MiB on v5e/v6e) and the budget allowed for double-buffered stream tiles.
_VMEM_LIMIT = min(max(_VMEM_CAP // 2, 32 * 1024 * 1024), 96 * 1024 * 1024)
_TILE_BUDGET = _VMEM_LIMIT // 2


def _pick_tn(N, D, B, itemsize=4, budget=_TILE_BUDGET):
    """Largest lane-dense N tile (multiple of 128) that divides N and whose
    double-buffered (tn, D) bank tile + (B, tn) output tile fit the budget."""
    for cand in (4096, 2048, 1024, 512, 256, 128):
        if N % cand == 0 and 2 * cand * (D + B) * itemsize <= budget:
            return cand
    return N                              # small / awkward N: single block


def _pick_tb(B, K, itemsize=4, budget=_TILE_BUDGET):
    """Batch tile for the loss kernel (multiple of 8 that divides B)."""
    for cand in (256, 128, 64, 32, 16, 8):
        if cand <= B and B % cand == 0 and 2 * cand * K * itemsize <= budget:
            return cand
    return B                              # tiny / awkward B: single block


# ----------------------------- Kernel 1: similarities -------------------------
def _similarity_kernel(npts_ref, mem_ref, out_ref):
    # Contract over D directly (lhs dim 1 with rhs dim 1): the MXU is fed
    # without materializing a transposed (D, tn) copy of the bank tile.
    # f32 inputs are kept to preserve the spec's numerics (bf16 inputs with
    # f32 accumulation is a further bandwidth option for large banks).
    out_ref[...] = jax.lax.dot_general(
        npts_ref[...].astype(jnp.float32),
        mem_ref[...].astype(jnp.float32),
        dimension_numbers=(((1,), (1,)), ((), ())),
        preferred_element_type=jnp.float32,
    )


def _compute_similarities(norm_points, memory_bank):
    B, D = norm_points.shape
    N = memory_bank.shape[0]
    tn = _pick_tn(N, D, B)
    return pl.pallas_call(
        _similarity_kernel,
        out_shape=jax.ShapeDtypeStruct((B, N), jnp.float32),
        grid=(N // tn,),
        in_specs=[
            pl.BlockSpec((B, D), lambda j: (0, 0)),         # resident points
            pl.BlockSpec((tn, D), lambda j: (j, 0)),        # streamed bank tile
        ],
        out_specs=pl.BlockSpec((B, tn), lambda j: (0, j)),  # lane-dense output
        compiler_params=pltpu.CompilerParams(
            dimension_semantics=("parallel",),
            vmem_limit_bytes=_VMEM_LIMIT,
        ),
    )(norm_points, memory_bank)


# -------------------- Kernel 2: entropy bisection + NCE loss ------------------
def _make_loss_kernel(target_entropy, iterations=13):
    target_entropy = float(target_entropy)
    NEG_BIG = -1e30        # exp(NEG_BIG * inv_t) == 0; NEG_BIG * inv_t stays finite in f32

    def kernel(hs_ref, pos_ref, pi_ref, logcp_ref, centers_ref, entropy_ref):
        hs = hs_ref[...].astype(jnp.float32)        # (tb, K) top-k similarities
        pos = pos_ref[...].astype(jnp.float32)      # (tb, 1) positive similarity
        pi = pi_ref[...]                            # (tb, 1) int32 column index
        tb, K = hs.shape

        # Positive-column mask on the sorted top-k matrix (spec:
        # F[range(B), point_indices] = 0) — built once, outside the loop.
        col = jax.lax.broadcasted_iota(jnp.int32, (tb, K), 1)
        mask = col == pi

        # Row-max shift: exponents stay <= 0 (the spec's exp(x/c - 1/c) has the
        # same effect for cosine sims <= 1), so exp never overflows.
        m = jnp.max(hs, axis=1, keepdims=True)                       # (tb, 1)
        hs_s = hs - m                                                # <= 0
        hs_pi_s = jnp.sum(jnp.where(mask, hs_s, 0.0), axis=1, keepdims=True)
        hsm = jnp.where(mask, NEG_BIG, hs_s)                         # masked col -> 0 after exp

        def entropy_eval(t):
            # H = log S - (1/S) * sum_j F_j * z_j, F_j = exp(z_j), z_j = hs_j / t.
            # One exp per element; log / reciprocal only per row (EUP relief).
            inv_t = pl.reciprocal(t)       # exact: bisection compares H vs target
            z = hsm * inv_t                                          # (tb, K)
            F = jnp.exp(z)                                           # masked -> 0
            S = jnp.sum(F, axis=1, keepdims=True)
            wsum = jnp.sum(F * z, axis=1, keepdims=True)
            ent = jnp.log(S) - wsum / S
            return ent, S, inv_t

        # binary_search_entropy: left=0, right=10 -> vcenter=5, scale=2.5
        centers = jnp.full((tb, 1), 5.0, dtype=jnp.float32)
        scale = 2.5
        for _ in range(iterations):                                  # static unroll
            ent, _, _ = entropy_eval(centers)
            centers = centers + jnp.where(ent < target_entropy, scale, -scale)
            scale = scale * 0.5
        ent, s_masked, inv_c = entropy_eval(centers)

        # NCE tail, reusing the final entropy pass:
        #   condition_p = exp((pos - m)/c) / sum_j exp((hs_j - m)/c)
        # (the spec's exp(-1/c) factor cancels between numerator and denominator;
        #  the denominator is the masked sum plus the masked-out column).
        den = s_masked + jnp.exp(hs_pi_s * inv_c)
        num = jnp.exp((pos - m) * inv_c)
        logcp_ref[...] = jnp.log(num / den + 1e-7)
        centers_ref[...] = centers
        entropy_ref[...] = ent

    return kernel


def _entropy_nce(hard_similarities, pos, point_indices, target_entropy):
    B, K = hard_similarities.shape
    tb = _pick_tb(B, K)
    kernel = _make_loss_kernel(target_entropy)
    out1 = jax.ShapeDtypeStruct((B, 1), jnp.float32)
    return pl.pallas_call(
        kernel,
        out_shape=(out1, out1, out1),
        grid=(B // tb,),
        in_specs=[
            pl.BlockSpec((tb, K), lambda i: (i, 0)),
            pl.BlockSpec((tb, 1), lambda i: (i, 0)),
            pl.BlockSpec((tb, 1), lambda i: (i, 0)),
        ],
        out_specs=(
            pl.BlockSpec((tb, 1), lambda i: (i, 0)),
            pl.BlockSpec((tb, 1), lambda i: (i, 0)),
            pl.BlockSpec((tb, 1), lambda i: (i, 0)),
        ),
        compiler_params=pltpu.CompilerParams(
            dimension_semantics=("parallel",),
            vmem_limit_bytes=_VMEM_LIMIT,
        ),
    )(hard_similarities, pos, point_indices)


# ------------------------------------ wrapper ---------------------------------
@functools.partial(jax.jit, static_argnums=(3, 4))
def fixed_entropy_hard_negative_loss(points, point_indices, memory_bank,
                                     target_entropy, n_background):
    """Forward of FixedEntropyHardNegativeLoss (target_centers=None path).
    Returns (loss, similarities, centers_mean, entropy_mean) as device arrays
    (call .item() outside if Python floats are needed)."""
    B = points.shape[0]
    x = points.astype(jnp.float32)
    # l2_normalize, hoisted out of the similarity kernel's grid loop.
    norm_points = x / jnp.sqrt(jnp.sum(x * x, axis=1, keepdims=True))

    similarities = _compute_similarities(norm_points, memory_bank)      # (B, N)

    # TODO(synk): sorted top-k stays as jax.lax.top_k glue — the spec's
    # index-based positive masking depends on the sorted order and sorted
    # top-k has no clean Pallas TPU equivalent.
    hard_similarities, _ = jax.lax.top_k(similarities, n_background)    # (B, K)

    pi = point_indices.astype(jnp.int32).reshape(B, 1)
    # Gather the B positive similarities here instead of shipping the full
    # (B, N) similarity matrix into the loss kernel.
    pos = jnp.take_along_axis(similarities, pi, axis=1)                 # (B, 1)

    logcp, centers, entropy = _entropy_nce(hard_similarities, pos, pi,
                                           float(target_entropy))
    loss = -jnp.mean(logcp)
    return loss, similarities, jnp.mean(centers), jnp.mean(entropy)


# ------------------------------ pure-JAX reference ----------------------------
def _reference(points, point_indices, memory_bank, target_entropy, n_background):
    x = points.astype(jnp.float32)
    npts = x / jnp.sqrt(jnp.sum(x * x, axis=1, keepdims=True))
    sim = npts @ memory_bank.astype(jnp.float32).T
    hs, _ = jax.lax.top_k(sim, n_background)
    B, K = hs.shape
    pi = point_indices.astype(jnp.int32)
    onehot = jax.nn.one_hot(pi, K, dtype=jnp.bool_)

    def calc_entropy(c):
        F = jnp.exp(hs / c[:, None])
        F = jnp.where(onehot, 0.0, F)
        r = F / jnp.sum(F, axis=1, keepdims=True)
        return -jnp.sum(r * jnp.log(r + 1e-7), axis=1)

    centers = jnp.full((B,), 5.0, jnp.float32)
    scale = 2.5
    for _ in range(13):
        ent = calc_entropy(centers)
        centers = centers + scale * (2.0 * (ent < target_entropy) - 1.0)
        scale /= 2.0
    ent = calc_entropy(centers)
    pos = jnp.take_along_axis(sim, pi[:, None], axis=1)[:, 0]
    num = jnp.exp(pos / centers - 1.0 / centers)
    den = jnp.sum(jnp.exp(hs / centers[:, None] - 1.0 / centers[:, None]), axis=1)
    loss = -jnp.mean(jnp.log(num / den + 1e-7))
    return loss, sim, jnp.mean(centers), jnp.mean(ent)


# ------------------------------------- main ------------------------------------
if __name__ == "__main__":
    B, D, N = 8, 32, 256          # batch, feature dim, memory-bank size
    n_background = 16             # k for topk (module default 4096; small here)
    target_entropy = 0.5 * math.log(n_background)

    key = jax.random.PRNGKey(0)
    k1, k2, k3 = jax.random.split(key, 3)

    points = jax.random.normal(k1, (B, D), dtype=jnp.float32)
    memory_bank = jax.random.normal(k2, (N, D), dtype=jnp.float32)
    memory_bank = memory_bank / jnp.sqrt(
        jnp.sum(memory_bank * memory_bank, axis=1, keepdims=True))
    # point_indices must be < n_background (the spec indexes the top-k matrix).
    point_indices = jax.random.randint(k3, (B,), 0, n_background, dtype=jnp.int32)

    loss, sims, c_mean, e_mean = fixed_entropy_hard_negative_loss(
        points, point_indices, memory_bank, target_entropy, n_background)
    jax.block_until_ready((loss, sims, c_mean, e_mean))

    # sanity check against a pure-JAX reference that mirrors the torch code
    ref_loss, ref_sims, ref_c, ref_e = _reference(
        points, point_indices, memory_bank, target_entropy, n_background)

    assert jnp.allclose(sims, ref_sims, atol=5e-4, rtol=5e-4), "similarities mismatch"
    assert jnp.allclose(loss, ref_loss, atol=5e-3, rtol=5e-3), "loss mismatch"
    assert abs(float(c_mean) - float(ref_c)) < 5e-3, "centers mean mismatch"
    assert abs(float(e_mean) - float(ref_e)) < 5e-3, "entropy mean mismatch"

    print("KERNEL_OK")
</pallas_src>

<mosaic_0001>
module attributes {stable_mosaic.version = 11 : i64} {
  func.func @_similarity_kernel(%arg0: i32, %arg1: memref<8x32xf32, #tpu.memory_space<vmem>>, %arg2: memref<256x32xf32, #tpu.memory_space<vmem>>, %arg3: memref<8x256xf32, #tpu.memory_space<vmem>>) attributes {dimension_semantics = [#tpu.dimension_semantics<parallel>], iteration_bounds = array<i64: 1>, scalar_prefetch = 0 : i64, scratch_operands = 0 : i64, tpu.core_type = #tpu.core_type<tc>, window_params = [{pipeline_mode = #tpu.pipeline_mode<synchronous>, transform_indices = @transform_0, window_bounds = array<i64: 8, 32>}, {transform_indices = @transform_1, window_bounds = array<i64: 256, 32>}, {transform_indices = @transform_2, window_bounds = array<i64: 8, 256>}]} {
    %c0 = arith.constant 0 : index
    %c0_0 = arith.constant 0 : index
    %0 = vector.load %arg1[%c0, %c0_0] : memref<8x32xf32, #tpu.memory_space<vmem>>, vector<8x32xf32>
    %c0_1 = arith.constant 0 : index
    %c0_2 = arith.constant 0 : index
    %1 = vector.load %arg2[%c0_1, %c0_2] : memref<256x32xf32, #tpu.memory_space<vmem>>, vector<256x32xf32>
    %cst = arith.constant dense<0.000000e+00> : vector<8x256xf32>
    %2 = tpu.matmul %0, %1, %cst {dimension_numbers = #tpu.dot_dimension_numbers<[1], [1], [0], [0], [0, 0, 1, 0], [], []>} : vector<8x32xf32>, vector<256x32xf32>, vector<8x256xf32> -> vector<8x256xf32>
    %c0_3 = arith.constant 0 : index
    %c0_4 = arith.constant 0 : index
    %3 = vector.load %arg3[%c0_3, %c0_4] : memref<8x256xf32, #tpu.memory_space<vmem>>, vector<8x256xf32>
    tpu.vector_store %arg3[%c0_3, %c0_4], %2 {strides = array<i32>} : memref<8x256xf32, #tpu.memory_space<vmem>>, vector<8x256xf32>,
    return
  }
  func.func @transform_0(%arg0: i32) -> (i32, i32) {
    %c0_i32 = arith.constant 0 : i32
    %c0_i32_0 = arith.constant 0 : i32
    %c0_i32_1 = arith.constant 0 : i32
    return %c0_i32, %c0_i32_0 : i32, i32
  }
  func.func @transform_1(%arg0: i32) -> (i32, i32) {
    %c0_i32 = arith.constant 0 : i32
    %c0_i32_0 = arith.constant 0 : i32
    return %arg0, %c0_i32 : i32, i32
  }
  func.func @transform_2(%arg0: i32) -> (i32, i32) {
    %c0_i32 = arith.constant 0 : i32
    %c0_i32_0 = arith.constant 0 : i32
    return %c0_i32, %arg0 : i32, i32
  }
}

module attributes {stable_mosaic.version = 11 : i64} {
  func.func @kernel(%arg0: i32, %arg1: memref<8x16xf32, #tpu.memory_space<vmem>>, %arg2: memref<8x1xf32, #tpu.memory_space<vmem>>, %arg3: memref<8x1xi32, #tpu.memory_space<vmem>>, %arg4: memref<8x1xf32, #tpu.memory_space<vmem>>, %arg5: memref<8x1xf32, #tpu.memory_space<vmem>>, %arg6: memref<8x1xf32, #tpu.memory_space<vmem>>) attributes {dimension_semantics = [#tpu.dimension_semantics<parallel>], iteration_bounds = array<i64: 1>, scalar_prefetch = 0 : i64, scratch_operands = 0 : i64, tpu.core_type = #tpu.core_type<tc>, window_params = [{transform_indices = @transform_0, window_bounds = array<i64: 8, 16>}, {transform_indices = @transform_1, window_bounds = array<i64: 8, 1>}, {transform_indices = @transform_2, window_bounds = array<i64: 8, 1>}, {transform_indices = @transform_3, window_bounds = array<i64: 8, 1>}, {transform_indices = @transform_4, window_bounds = array<i64: 8, 1>}, {transform_indices = @transform_5, window_bounds = array<i64: 8, 1>}]} {
    %c0 = arith.constant 0 : index
    %c0_0 = arith.constant 0 : index
    %0 = vector.load %arg1[%c0, %c0_0] : memref<8x16xf32, #tpu.memory_space<vmem>>, vector<8x16xf32>
    %c0_1 = arith.constant 0 : index
    %c0_2 = arith.constant 0 : index
    %1 = vector.load %arg2[%c0_1, %c0_2] : memref<8x1xf32, #tpu.memory_space<vmem>>, vector<8x1xf32>
    %c0_3 = arith.constant 0 : index
    %c0_4 = arith.constant 0 : index
    %2 = vector.load %arg3[%c0_3, %c0_4] : memref<8x1xi32, #tpu.memory_space<vmem>>, vector<8x1xi32>
    %3 = tpu.iota {dimensions = array<i32: 1>} : vector<8x16xi32>
    %4 = vector.broadcast %2 : vector<8x1xi32> to vector<8x16xi32>
    %5 = arith.cmpi eq, %3, %4 : vector<8x16xi32>
    %cst = arith.constant dense<0xFF800000> : vector<8xf32>
    %6 = vector.multi_reduction <maximumf>, %0, %cst [1] : vector<8x16xf32> to vector<8xf32>
    %7 = vector.shape_cast %6 : vector<8xf32> to vector<8x1xf32>
    %8 = vector.broadcast %7 : vector<8x1xf32> to vector<8x16xf32>
    %9 = arith.subf %0, %8 : vector<8x16xf32>
    %cst_5 = arith.constant 0.000000e+00 : f32
    %10 = vector.broadcast %cst_5 : f32 to vector<8x16xf32>
    %11 = arith.select %5, %9, %10 : vector<8x16xi1>, vector<8x16xf32>
    %cst_6 = arith.constant dense<0.000000e+00> : vector<8xf32>
    %12 = vector.multi_reduction <add>, %11, %cst_6 [1] : vector<8x16xf32> to vector<8xf32>
    %13 = vector.shape_cast %12 : vector<8xf32> to vector<8x1xf32>
    %cst_7 = arith.constant -1.000000e+30 : f32
    %14 = vector.broadcast %cst_7 : f32 to vector<8x16xf32>
    %15 = arith.select %5, %14, %9 : vector<8x16xi1>, vector<8x16xf32>
    %cst_8 = arith.constant 5.000000e+00 : f32
    %16 = vector.broadcast %cst_8 : f32 to vector<8x1xf32>
    %17 = tpu.reciprocal %16 : vector<8x1xf32> -> vector<8x1xf32>
    %18 = vector.broadcast %17 : vector<8x1xf32> to vector<8x16xf32>
    %19 = arith.mulf %15, %18 : vector<8x16xf32>
    %20 = math.exp %19 : vector<8x16xf32>
    %cst_9 = arith.constant dense<0.000000e+00> : vector<8xf32>
    %21 = vector.multi_reduction <add>, %20, %cst_9 [1] : vector<8x16xf32> to vector<8xf32>
    %22 = vector.shape_cast %21 : vector<8xf32> to vector<8x1xf32>
    %23 = arith.mulf %20, %19 : vector<8x16xf32>
    %cst_10 = arith.constant dense<0.000000e+00> : vector<8xf32>
    %24 = vector.multi_reduction <add>, %23, %cst_10 [1] : vector<8x16xf32> to vector<8xf32>
    %25 = vector.shape_cast %24 : vector<8xf32> to vector<8x1xf32>
    %26 = math.log %22 : vector<8x1xf32>
    %27 = arith.divf %25, %22 : vector<8x1xf32>
    %28 = arith.subf %26, %27 : vector<8x1xf32>
    %cst_11 = arith.constant 1.38629436 : f32
    %29 = vector.broadcast %cst_11 : f32 to vector<8x1xf32>
    %30 = arith.cmpf olt, %28, %29 : vector<8x1xf32>
    %cst_12 = arith.constant 2.500000e+00 : f32
    %cst_13 = arith.constant -2.500000e+00 : f32
    %31 = vector.broadcast %cst_12 : f32 to vector<8x1xf32>
    %32 = vector.broadcast %cst_13 : f32 to vector<8x1xf32>
    %33 = arith.select %30, %31, %32 : vector<8x1xi1>, vector<8x1xf32>
    %34 = arith.addf %16, %33 : vector<8x1xf32>
    %35 = tpu.reciprocal %34 : vector<8x1xf32> -> vector<8x1xf32>
    %36 = vector.broadcast %35 : vector<8x1xf32> to vector<8x16xf32>
    %37 = arith.mulf %15, %36 : vector<8x16xf32>
    %38 = math.exp %37 : vector<8x16xf32>
    %cst_14 = arith.constant dense<0.000000e+00> : vector<8xf32>
    %39 = vector.multi_reduction <add>, %38, %cst_14 [1] : vector<8x16xf32> to vector<8xf32>
    %40 = vector.shape_cast %39 : vector<8xf32> to vector<8x1xf32>
    %41 = arith.mulf %38, %37 : vector<8x16xf32>
    %cst_15 = arith.constant dense<0.000000e+00> : vector<8xf32>
    %42 = vector.multi_reduction <add>, %41, %cst_15 [1] : vector<8x16xf32> to vector<8xf32>
    %43 = vector.shape_cast %42 : vector<8xf32> to vector<8x1xf32>
    %44 = math.log %40 : vector<8x1xf32>
    %45 = arith.divf %43, %40 : vector<8x1xf32>
    %46 = arith.subf %44, %45 : vector<8x1xf32>
    %cst_16 = arith.constant 1.38629436 : f32
    %47 = vector.broadcast %cst_16 : f32 to vector<8x1xf32>
    %48 = arith.cmpf olt, %46, %47 : vector<8x1xf32>
    %cst_17 = arith.constant 1.250000e+00 : f32
    %cst_18 = arith.constant -1.250000e+00 : f32
    %49 = vector.broadcast %cst_17 : f32 to vector<8x1xf32>
    %50 = vector.broadcast %cst_18 : f32 to vector<8x1xf32>
    %51 = arith.select %48, %49, %50 : vector<8x1xi1>, vector<8x1xf32>
    %52 = arith.addf %34, %51 : vector<8x1xf32>
    %53 = tpu.reciprocal %52 : vector<8x1xf32> -> vector<8x1xf32>
    %54 = vector.broadcast %53 : vector<8x1xf32> to vector<8x16xf32>
    %55 = arith.mulf %15, %54 : vector<8x16xf32>
    %56 = math.exp %55 : vector<8x16xf32>
    %cst_19 = arith.constant dense<0.000000e+00> : vector<8xf32>
    %57 = vector.multi_reduction <add>, %56, %cst_19 [1] : vector<8x16xf32> to vector<8xf32>
    %58 = vector.shape_cast %57 : vector<8xf32> to vector<8x1xf32>
    %59 = arith.mulf %56, %55 : vector<8x16xf32>
    %cst_20 = arith.constant dense<0.000000e+00> : vector<8xf32>
    %60 = vector.multi_reduction <add>, %59, %cst_20 [1] : vector<8x16xf32> to vector<8xf32>
    %61 = vector.shape_cast %60 : vector<8xf32> to vector<8x1xf32>
    %62 = math.log %58 : vector<8x1xf32>
    %63 = arith.divf %61, %58 : vector<8x1xf32>
    %64 = arith.subf %62, %63 : vector<8x1xf32>
    %cst_21 = arith.constant 1.38629436 : f32
    %65 = vector.broadcast %cst_21 : f32 to vector<8x1xf32>
    %66 = arith.cmpf olt, %64, %65 : vector<8x1xf32>
    %cst_22 = arith.constant 6.250000e-01 : f32
    %cst_23 = arith.constant -6.250000e-01 : f32
    %67 = vector.broadcast %cst_22 : f32 to vector<8x1xf32>
    %68 = vector.broadcast %cst_23 : f32 to vector<8x1xf32>
    %69 = arith.select %66, %67, %68 : vector<8x1xi1>, vector<8x1xf32>
    %70 = arith.addf %52, %69 : vector<8x1xf32>
    %71 = tpu.reciprocal %70 : vector<8x1xf32> -> vector<8x1xf32>
    %72 = vector.broadcast %71 : vector<8x1xf32> to vector<8x16xf32>
    %73 = arith.mulf %15, %72 : vector<8x16xf32>
    %74 = math.exp %73 : vector<8x16xf32>
    %cst_24 = arith.constant dense<0.000000e+00> : vector<8xf32>
    %75 = vector.multi_reduction <add>, %74, %cst_24 [1] : vector<8x16xf32> to vector<8xf32>
    %76 = vector.shape_cast %75 : vector<8xf32> to vector<8x1xf32>
    %77 = arith.mulf %74, %73 : vector<8x16xf32>
    %cst_25 = arith.constant dense<0.000000e+00> : vector<8xf32>
    %78 = vector.multi_reduction <add>, %77, %cst_25 [1] : vector<8x16xf32> to vector<8xf32>
    %79 = vector.shape_cast %78 : vector<8xf32> to vector<8x1xf32>
    %80 = math.log %76 : vector<8x1xf32>
    %81 = arith.divf %79, %76 : vector<8x1xf32>
    %82 = arith.subf %80, %81 : vector<8x1xf32>
    %cst_26 = arith.constant 1.38629436 : f32
    %83 = vector.broadcast %cst_26 : f32 to vector<8x1xf32>
    %84 = arith.cmpf olt, %82, %83 : vector<8x1xf32>
    %cst_27 = arith.constant 3.125000e-01 : f32
    %cst_28 = arith.constant -3.125000e-01 : f32
    %85 = vector.broadcast %cst_27 : f32 to vector<8x1xf32>
    %86 = vector.broadcast %cst_28 : f32 to vector<8x1xf32>
    %87 = arith.select %84, %85, %86 : vector<8x1xi1>, vector<8x1xf32>
    %88 = arith.addf %70, %87 : vector<8x1xf32>
    %89 = tpu.reciprocal %88 : vector<8x1xf32> -> vector<8x1xf32>
    %90 = vector.broadcast %89 : vector<8x1xf32> to vector<8x16xf32>
    %91 = arith.mulf %15, %90 : vector<8x16xf32>
    %92 = math.exp %91 : vector<8x16xf32>
    %cst_29 = arith.constant dense<0.000000e+00> : vector<8xf32>
    %93 = vector.multi_reduction <add>, %92, %cst_29 [1] : vector<8x16xf32> to vector<8xf32>
    %94 = vector.shape_cast %93 : vector<8xf32> to vector<8x1xf32>
    %95 = arith.mulf %92, %91 : vector<8x16xf32>
    %cst_30 = arith.constant dense<0.000000e+00> : vector<8xf32>
    %96 = vector.multi_reduction <add>, %95, %cst_30 [1] : vector<8x16xf32> to vector<8xf32>
    %97 = vector.shape_cast %96 : vector<8xf32> to vector<8x1xf32>
    %98 = math.log %94 : vector<8x1xf32>
    %99 = arith.divf %97, %94 : vector<8x1xf32>
    %100 = arith.subf %98, %99 : vector<8x1xf32>
    %cst_31 = arith.constant 1.38629436 : f32
    %101 = vector.broadcast %cst_31 : f32 to vector<8x1xf32>
    %102 = arith.cmpf olt, %100, %101 : vector<8x1xf32>
    %cst_32 = arith.constant 1.562500e-01 : f32
    %cst_33 = arith.constant -1.562500e-01 : f32
    %103 = vector.broadcast %cst_32 : f32 to vector<8x1xf32>
    %104 = vector.broadcast %cst_33 : f32 to vector<8x1xf32>
    %105 = arith.select %102, %103, %104 : vector<8x1xi1>, vector<8x1xf32>
    %106 = arith.addf %88, %105 : vector<8x1xf32>
    %107 = tpu.reciprocal %106 : vector<8x1xf32> -> vector<8x1xf32>
    %108 = vector.broadcast %107 : vector<8x1xf32> to vector<8x16xf32>
    %109 = arith.mulf %15, %108 : vector<8x16xf32>
    %110 = math.exp %109 : vector<8x16xf32>
    %cst_34 = arith.constant dense<0.000000e+00> : vector<8xf32>
    %111 = vector.multi_reduction <add>, %110, %cst_34 [1] : vector<8x16xf32> to vector<8xf32>
    %112 = vector.shape_cast %111 : vector<8xf32> to vector<8x1xf32>
    %113 = arith.mulf %110, %109 : vector<8x16xf32>
    %cst_35 = arith.constant dense<0.000000e+00> : vector<8xf32>
    %114 = vector.multi_reduction <add>, %113, %cst_35 [1] : vector<8x16xf32> to vector<8xf32>
    %115 = vector.shape_cast %114 : vector<8xf32> to vector<8x1xf32>
    %116 = math.log %112 : vector<8x1xf32>
    %117 = arith.divf %115, %112 : vector<8x1xf32>
    %118 = arith.subf %116, %117 : vector<8x1xf32>
    %cst_36 = arith.constant 1.38629436 : f32
    %119 = vector.broadcast %cst_36 : f32 to vector<8x1xf32>
    %120 = arith.cmpf olt, %118, %119 : vector<8x1xf32>
    %cst_37 = arith.constant 7.812500e-02 : f32
    %cst_38 = arith.constant -7.812500e-02 : f32
    %121 = vector.broadcast %cst_37 : f32 to vector<8x1xf32>
    %122 = vector.broadcast %cst_38 : f32 to vector<8x1xf32>
    %123 = arith.select %120, %121, %122 : vector<8x1xi1>, vector<8x1xf32>
    %124 = arith.addf %106, %123 : vector<8x1xf32>
    %125 = tpu.reciprocal %124 : vector<8x1xf32> -> vector<8x1xf32>
    %126 = vector.broadcast %125 : vector<8x1xf32> to vector<8x16xf32>
    %127 = arith.mulf %15, %126 : vector<8x16xf32>
    %128 = math.exp %127 : vector<8x16xf32>
    %cst_39 = arith.constant dense<0.000000e+00> : vector<8xf32>
    %129 = vector.multi_reduction <add>, %128, %cst_39 [1] : vector<8x16xf32> to vector<8xf32>
    %130 = vector.shape_cast %129 : vector<8xf32> to vector<8x1xf32>
    %131 = arith.mulf %128, %127 : vector<8x16xf32>
    %cst_40 = arith.constant dense<0.000000e+00> : vector<8xf32>
    %132 = vector.multi_reduction <add>, %131, %cst_40 [1] : vector<8x16xf32> to vector<8xf32>
    %133 = vector.shape_cast %132 : vector<8xf32> to vector<8x1xf32>
    %134 = math.log %130 : vector<8x1xf32>
    %135 = arith.divf %133, %130 : vector<8x1xf32>
    %136 = arith.subf %134, %135 : vector<8x1xf32>
    %cst_41 = arith.constant 1.38629436 : f32
    %137 = vector.broadcast %cst_41 : f32 to vector<8x1xf32>
    %138 = arith.cmpf olt, %136, %137 : vector<8x1xf32>
    %cst_42 = arith.constant 3.906250e-02 : f32
    %cst_43 = arith.constant -3.906250e-02 : f32
    %139 = vector.broadcast %cst_42 : f32 to vector<8x1xf32>
    %140 = vector.broadcast %cst_43 : f32 to vector<8x1xf32>
    %141 = arith.select %138, %139, %140 : vector<8x1xi1>, vector<8x1xf32>
    %142 = arith.addf %124, %141 : vector<8x1xf32>
    %143 = tpu.reciprocal %142 : vector<8x1xf32> -> vector<8x1xf32>
    %144 = vector.broadcast %143 : vector<8x1xf32> to vector<8x16xf32>
    %145 = arith.mulf %15, %144 : vector<8x16xf32>
    %146 = math.exp %145 : vector<8x16xf32>
    %cst_44 = arith.constant dense<0.000000e+00> : vector<8xf32>
    %147 = vector.multi_reduction <add>, %146, %cst_44 [1] : vector<8x16xf32> to vector<8xf32>
    %148 = vector.shape_cast %147 : vector<8xf32> to vector<8x1xf32>
    %149 = arith.mulf %146, %145 : vector<8x16xf32>
    %cst_45 = arith.constant dense<0.000000e+00> : vector<8xf32>
    %150 = vector.multi_reduction <add>, %149, %cst_45 [1] : vector<8x16xf32> to vector<8xf32>
    %151 = vector.shape_cast %150 : vector<8xf32> to vector<8x1xf32>
    %152 = math.log %148 : vector<8x1xf32>
    %153 = arith.divf %151, %148 : vector<8x1xf32>
    %154 = arith.subf %152, %153 : vector<8x1xf32>
    %cst_46 = arith.constant 1.38629436 : f32
    %155 = vector.broadcast %cst_46 : f32 to vector<8x1xf32>
    %156 = arith.cmpf olt, %154, %155 : vector<8x1xf32>
    %cst_47 = arith.constant 0.01953125 : f32
    %cst_48 = arith.constant -0.01953125 : f32
    %157 = vector.broadcast %cst_47 : f32 to vector<8x1xf32>
    %158 = vector.broadcast %cst_48 : f32 to vector<8x1xf32>
    %159 = arith.select %156, %157, %158 : vector<8x1xi1>, vector<8x1xf32>
    %160 = arith.addf %142, %159 : vector<8x1xf32>
    %161 = tpu.reciprocal %160 : vector<8x1xf32> -> vector<8x1xf32>
    %162 = vector.broadcast %161 : vector<8x1xf32> to vector<8x16xf32>
    %163 = arith.mulf %15, %162 : vector<8x16xf32>
    %164 = math.exp %163 : vector<8x16xf32>
    %cst_49 = arith.constant dense<0.000000e+00> : vector<8xf32>
    %165 = vector.multi_reduction <add>, %164, %cst_49 [1] : vector<8x16xf32> to vector<8xf32>
    %166 = vector.shape_cast %165 : vector<8xf32> to vector<8x1xf32>
    %167 = arith.mulf %164, %163 : vector<8x16xf32>
    %cst_50 = arith.constant dense<0.000000e+00> : vector<8xf32>
    %168 = vector.multi_reduction <add>, %167, %cst_50 [1] : vector<8x16xf32> to vector<8xf32>
    %169 = vector.shape_cast %168 : vector<8xf32> to vector<8x1xf32>
    %170 = math.log %166 : vector<8x1xf32>
    %171 = arith.divf %169, %166 : vector<8x1xf32>
    %172 = arith.subf %170, %171 : vector<8x1xf32>
    %cst_51 = arith.constant 1.38629436 : f32
    %173 = vector.broadcast %cst_51 : f32 to vector<8x1xf32>
    %174 = arith.cmpf olt, %172, %173 : vector<8x1xf32>
    %cst_52 = arith.constant 0.009765625 : f32
    %cst_53 = arith.constant -0.009765625 : f32
    %175 = vector.broadcast %cst_52 : f32 to vector<8x1xf32>
    %176 = vector.broadcast %cst_53 : f32 to vector<8x1xf32>
    %177 = arith.select %174, %175, %176 : vector<8x1xi1>, vector<8x1xf32>
    %178 = arith.addf %160, %177 : vector<8x1xf32>
    %179 = tpu.reciprocal %178 : vector<8x1xf32> -> vector<8x1xf32>
    %180 = vector.broadcast %179 : vector<8x1xf32> to vector<8x16xf32>
    %181 = arith.mulf %15, %180 : vector<8x16xf32>
    %182 = math.exp %181 : vector<8x16xf32>
    %cst_54 = arith.constant dense<0.000000e+00> : vector<8xf32>
    %183 = vector.multi_reduction <add>, %182, %cst_54 [1] : vector<8x16xf32> to vector<8xf32>
    %184 = vector.shape_cast %183 : vector<8xf32> to vector<8x1xf32>
    %185 = arith.mulf %182, %181 : vector<8x16xf32>
    %cst_55 = arith.constant dense<0.000000e+00> : vector<8xf32>
    %186 = vector.multi_reduction <add>, %185, %cst_55 [1] : vector<8x16xf32> to vector<8xf32>
    %187 = vector.shape_cast %186 : vector<8xf32> to vector<8x1xf32>
    %188 = math.log %184 : vector<8x1xf32>
    %189 = arith.divf %187, %184 : vector<8x1xf32>
    %190 = arith.subf %188, %189 : vector<8x1xf32>
    %cst_56 = arith.constant 1.38629436 : f32
    %191 = vector.broadcast %cst_56 : f32 to vector<8x1xf32>
    %192 = arith.cmpf olt, %190, %191 : vector<8x1xf32>
    %cst_57 = arith.constant 0.0048828125 : f32
    %cst_58 = arith.constant -0.0048828125 : f32
    %193 = vector.broadcast %cst_57 : f32 to vector<8x1xf32>
    %194 = vector.broadcast %cst_58 : f32 to vector<8x1xf32>
    %195 = arith.select %192, %193, %194 : vector<8x1xi1>, vector<8x1xf32>
    %196 = arith.addf %178, %195 : vector<8x1xf32>
    %197 = tpu.reciprocal %196 : vector<8x1xf32> -> vector<8x1xf32>
    %198 = vector.broadcast %197 : vector<8x1xf32> to vector<8x16xf32>
    %199 = arith.mulf %15, %198 : vector<8x16xf32>
    %200 = math.exp %199 : vector<8x16xf32>
    %cst_59 = arith.constant dense<0.000000e+00> : vector<8xf32>
    %201 = vector.multi_reduction <add>, %200, %cst_59 [1] : vector<8x16xf32> to vector<8xf32>
    %202 = vector.shape_cast %201 : vector<8xf32> to vector<8x1xf32>
    %203 = arith.mulf %200, %199 : vector<8x16xf32>
    %cst_60 = arith.constant dense<0.000000e+00> : vector<8xf32>
    %204 = vector.multi_reduction <add>, %203, %cst_60 [1] : vector<8x16xf32> to vector<8xf32>
    %205 = vector.shape_cast %204 : vector<8xf32> to vector<8x1xf32>
    %206 = math.log %202 : vector<8x1xf32>
    %207 = arith.divf %205, %202 : vector<8x1xf32>
    %208 = arith.subf %206, %207 : vector<8x1xf32>
    %cst_61 = arith.constant 1.38629436 : f32
    %209 = vector.broadcast %cst_61 : f32 to vector<8x1xf32>
    %210 = arith.cmpf olt, %208, %209 : vector<8x1xf32>
    %cst_62 = arith.constant 0.00244140625 : f32
    %cst_63 = arith.constant -0.00244140625 : f32
    %211 = vector.broadcast %cst_62 : f32 to vector<8x1xf32>
    %212 = vector.broadcast %cst_63 : f32 to vector<8x1xf32>
    %213 = arith.select %210, %211, %212 : vector<8x1xi1>, vector<8x1xf32>
    %214 = arith.addf %196, %213 : vector<8x1xf32>
    %215 = tpu.reciprocal %214 : vector<8x1xf32> -> vector<8x1xf32>
    %216 = vector.broadcast %215 : vector<8x1xf32> to vector<8x16xf32>
    %217 = arith.mulf %15, %216 : vector<8x16xf32>
    %218 = math.exp %217 : vector<8x16xf32>
    %cst_64 = arith.constant dense<0.000000e+00> : vector<8xf32>
    %219 = vector.multi_reduction <add>, %218, %cst_64 [1] : vector<8x16xf32> to vector<8xf32>
    %220 = vector.shape_cast %219 : vector<8xf32> to vector<8x1xf32>
    %221 = arith.mulf %218, %217 : vector<8x16xf32>
    %cst_65 = arith.constant dense<0.000000e+00> : vector<8xf32>
    %222 = vector.multi_reduction <add>, %221, %cst_65 [1] : vector<8x16xf32> to vector<8xf32>
    %223 = vector.shape_cast %222 : vector<8xf32> to vector<8x1xf32>
    %224 = math.log %220 : vector<8x1xf32>
    %225 = arith.divf %223, %220 : vector<8x1xf32>
    %226 = arith.subf %224, %225 : vector<8x1xf32>
    %cst_66 = arith.constant 1.38629436 : f32
    %227 = vector.broadcast %cst_66 : f32 to vector<8x1xf32>
    %228 = arith.cmpf olt, %226, %227 : vector<8x1xf32>
    %cst_67 = arith.constant 0.00122070313 : f32
    %cst_68 = arith.constant -0.00122070313 : f32
    %229 = vector.broadcast %cst_67 : f32 to vector<8x1xf32>
    %230 = vector.broadcast %cst_68 : f32 to vector<8x1xf32>
    %231 = arith.select %228, %229, %230 : vector<8x1xi1>, vector<8x1xf32>
    %232 = arith.addf %214, %231 : vector<8x1xf32>
    %233 = tpu.reciprocal %232 : vector<8x1xf32> -> vector<8x1xf32>
    %234 = vector.broadcast %233 : vector<8x1xf32> to vector<8x16xf32>
    %235 = arith.mulf %15, %234 : vector<8x16xf32>
    %236 = math.exp %235 : vector<8x16xf32>
    %cst_69 = arith.constant dense<0.000000e+00> : vector<8xf32>
    %237 = vector.multi_reduction <add>, %236, %cst_69 [1] : vector<8x16xf32> to vector<8xf32>
    %238 = vector.shape_cast %237 : vector<8xf32> to vector<8x1xf32>
    %239 = arith.mulf %236, %235 : vector<8x16xf32>
    %cst_70 = arith.constant dense<0.000000e+00> : vector<8xf32>
    %240 = vector.multi_reduction <add>, %239, %cst_70 [1] : vector<8x16xf32> to vector<8xf32>
    %241 = vector.shape_cast %240 : vector<8xf32> to vector<8x1xf32>
    %242 = math.log %238 : vector<8x1xf32>
    %243 = arith.divf %241, %238 : vector<8x1xf32>
    %244 = arith.subf %242, %243 : vector<8x1xf32>
    %cst_71 = arith.constant 1.38629436 : f32
    %245 = vector.broadcast %cst_71 : f32 to vector<8x1xf32>
    %246 = arith.cmpf olt, %244, %245 : vector<8x1xf32>
    %cst_72 = arith.constant 6.10351563E-4 : f32
    %cst_73 = arith.constant -6.10351563E-4 : f32
    %247 = vector.broadcast %cst_72 : f32 to vector<8x1xf32>
    %248 = vector.broadcast %cst_73 : f32 to vector<8x1xf32>
    %249 = arith.select %246, %247, %248 : vector<8x1xi1>, vector<8x1xf32>
    %250 = arith.addf %232, %249 : vector<8x1xf32>
    %251 = tpu.reciprocal %250 : vector<8x1xf32> -> vector<8x1xf32>
    %252 = vector.broadcast %251 : vector<8x1xf32> to vector<8x16xf32>
    %253 = arith.mulf %15, %252 : vector<8x16xf32>
    %254 = math.exp %253 : vector<8x16xf32>
    %cst_74 = arith.constant dense<0.000000e+00> : vector<8xf32>
    %255 = vector.multi_reduction <add>, %254, %cst_74 [1] : vector<8x16xf32> to vector<8xf32>
    %256 = vector.shape_cast %255 : vector<8xf32> to vector<8x1xf32>
    %257 = arith.mulf %254, %253 : vector<8x16xf32>
    %cst_75 = arith.constant dense<0.000000e+00> : vector<8xf32>
    %258 = vector.multi_reduction <add>, %257, %cst_75 [1] : vector<8x16xf32> to vector<8xf32>
    %259 = vector.shape_cast %258 : vector<8xf32> to vector<8x1xf32>
    %260 = math.log %256 : vector<8x1xf32>
    %261 = arith.divf %259, %256 : vector<8x1xf32>
    %262 = arith.subf %260, %261 : vector<8x1xf32>
    %263 = arith.mulf %13, %251 : vector<8x1xf32>
    %264 = math.exp %263 : vector<8x1xf32>
    %265 = arith.addf %256, %264 : vector<8x1xf32>
    %266 = arith.subf %1, %7 : vector<8x1xf32>
    %267 = arith.mulf %266, %251 : vector<8x1xf32>
    %268 = math.exp %267 : vector<8x1xf32>
    %269 = arith.divf %268, %265 : vector<8x1xf32>
    %cst_76 = arith.constant 1.000000e-07 : f32
    %270 = vector.broadcast %cst_76 : f32 to vector<8x1xf32>
    %271 = arith.addf %269, %270 : vector<8x1xf32>
    %272 = math.log %271 : vector<8x1xf32>
    %c0_77 = arith.constant 0 : index
    %c0_78 = arith.constant 0 : index
    %273 = vector.load %arg4[%c0_77, %c0_78] : memref<8x1xf32, #tpu.memory_space<vmem>>, vector<8x1xf32>
    tpu.vector_store %arg4[%c0_77, %c0_78], %272 {strides = array<i32>} : memref<8x1xf32, #tpu.memory_space<vmem>>, vector<8x1xf32>,
    %c0_79 = arith.constant 0 : index
    %c0_80 = arith.constant 0 : index
    %274 = vector.load %arg5[%c0_79, %c0_80] : memref<8x1xf32, #tpu.memory_space<vmem>>, vector<8x1xf32>
    tpu.vector_store %arg5[%c0_79, %c0_80], %250 {strides = array<i32>} : memref<8x1xf32, #tpu.memory_space<vmem>>, vector<8x1xf32>,
    %c0_81 = arith.constant 0 : index
    %c0_82 = arith.constant 0 : index
    %275 = vector.load %arg6[%c0_81, %c0_82] : memref<8x1xf32, #tpu.memory_space<vmem>>, vector<8x1xf32>
    tpu.vector_store %arg6[%c0_81, %c0_82], %262 {strides = array<i32>} : memref<8x1xf32, #tpu.memory_space<vmem>>, vector<8x1xf32>,
    return
  }
  func.func @transform_0(%arg0: i32) -> (i32, i32) {
    %c0_i32 = arith.constant 0 : i32
    %c0_i32_0 = arith.constant 0 : i32
    return %arg0, %c0_i32 : i32, i32
  }
  func.func @transform_1(%arg0: i32) -> (i32, i32) {
    %c0_i32 = arith.constant 0 : i32
    %c0_i32_0 = arith.constant 0 : i32
    return %arg0, %c0_i32 : i32, i32
  }
  func.func @transform_2(%arg0: i32) -> (i32, i32) {
    %c0_i32 = arith.constant 0 : i32
    %c0_i32_0 = arith.constant 0 : i32
    return %arg0, %c0_i32 : i32, i32
  }
  func.func @transform_3(%arg0: i32) -> (i32, i32) {
    %c0_i32 = arith.constant 0 : i32
    %c0_i32_0 = arith.constant 0 : i32
    return %arg0, %c0_i32 : i32, i32
  }
  func.func @transform_4(%arg0: i32) -> (i32, i32) {
    %c0_i32 = arith.constant 0 : i32
    %c0_i32_0 = arith.constant 0 : i32
    return %arg0, %c0_i32 : i32, i32
  }
  func.func @transform_5(%arg0: i32) -> (i32, i32) {
    %c0_i32 = arith.constant 0 : i32
    %c0_i32_0 = arith.constant 0 : i32
    return %arg0, %c0_i32 : i32, i32
  }
}

</mosaic_0001>

<bundles_post_ra>
// kernel: fixed_entropy_hard_negative_loss.2
= control target key start
LH: loop header
LB: loop body
LE: loop exit
PB: predicated region body
PF: predicated region fallthrough
CT: control target
= control target key end

     0   :  { %vm44_vm0 = vcmask 261120   ;;  %s496_s1 = inlined_call_operand.vmem [shape: f32[256,32], index: 1, kind: input, shape index: {}]   ;;  %s497_s0 = inlined_call_operand.vmem [shape: f32[8,32], index: 0, kind: input, shape index: {}]   ;;  %s498_s2 = inlined_call_operand.vmem [shape: f32[8,256], index: 2, kind: output, shape index: {}]  }
   0x1   :  { %v28_v0 = vld [vmem:[%s496_s1 + $0x80] sm:$0xff]  ;;  %v29_v1 = vld [vmem:[%s496_s1 + $0x88] sm:$0xff]  ;;  %vm359_vm1 = vmpackc.low %vm44_vm0, %vm44_vm0 }
   0x2   :  { %v288_v3 = vpack.c.bf16 %v29_v1, %v28_v0  ;;  %v12_v4 = vld [vmem:[%s496_s1] sm:$0xff]  ;;  %v13_v5 = vld [vmem:[%s496_s1 + $0x8] sm:$0xff]  ;;  %v30_v6 = vld [vmem:[%s496_s1 + $0x90] sm:$0xff] }
   0x3   :  { %v291_v7 = vpack.c.bf16 %v13_v5, %v12_v4  ;;  %v31_v8 = vld [vmem:[%s496_s1 + $0x98] sm:$0xff]  ;;  %v14_v10 = vld [vmem:[%s496_s1 + $0x10] sm:$0xff]  ;;  %v32_v12 = vld [vmem:[%s496_s1 + $0xa0] sm:$0xff] }
   0x4   :  { %290 = vmatprep.subr.msk.bf16.mxu0 %vm359_vm1, %v288_v3  ;;  %v294_v9 = vpack.c.bf16 %v31_v8, %v30_v6  ;;  %v15_v11 = vld [vmem:[%s496_s1 + $0x18] sm:$0xff]  ;;  %v33_v13 = vld [vmem:[%s496_s1 + $0xa8] sm:$0xff]  ;;  %v11_v16 = vld [vmem:[%s497_s0] sm:$0xff] }
   0x5   :  { %293 = vmatpush3.bf16.xpose.msk.msra.mxu0 %vm359_vm1, %v291_v7  ;;  %v297_v14 = vpack.c.bf16 %v15_v11, %v14_v10  ;;  %v300_v15 = vpack.c.bf16 %v33_v13, %v32_v12  ;;  %286 = vmatprep.mubr.msk.f32.mxu0 %vm44_vm0, %v11_v16  ;;  %v16_v17 = vld [vmem:[%s496_s1 + $0x20] sm:$0xff]  ;;  %v17_v18 = vld [vmem:[%s496_s1 + $0x28] sm:$0xff]  ;;  %v34_v19 = vld [vmem:[%s496_s1 + $0xb0] sm:$0xff] }
   0x6   :  { %296 = vmatprep.subr.msk.bf16.mxu0 %vm359_vm1, %v294_v9  ;;  %v35_v20 = vld [vmem:[%s496_s1 + $0xb8] sm:$0xff]  ;;  %v303_v21 = vpack.c.bf16 %v17_v18, %v16_v17  ;;  %v18_v23 = vld [vmem:[%s496_s1 + $0x30] sm:$0xff]  ;;  %v36_v25 = vld [vmem:[%s496_s1 + $0xc0] sm:$0xff] }
   0x7   :  { %v306_v22 = vpack.c.bf16 %v35_v20, %v34_v19  ;;  %v19_v24 = vld [vmem:[%s496_s1 + $0x38] sm:$0xff]  ;;  %v37_v26 = vld [vmem:[%s496_s1 + $0xc8] sm:$0xff]  ;;  %v20_v29 = vld [vmem:[%s496_s1 + $0x40] sm:$0xff] }
   0x8   :  { %v309_v27 = vpack.c.bf16 %v19_v24, %v18_v23  ;;  %v312_v28 = vpack.c.bf16 %v37_v26, %v36_v25  ;;  %v21_v30 = vld [vmem:[%s496_s1 + $0x48] sm:$0xff]  ;;  %v38_v31 = vld [vmem:[%s496_s1 + $0xd0] sm:$0xff]  ;;  %v39_v32 = vld [vmem:[%s496_s1 + $0xd8] sm:$0xff] }
   0x9   :  { %v315_v33 = vpack.c.bf16 %v21_v30, %v20_v29  ;;  %v318_v34 = vpack.c.bf16 %v39_v32, %v38_v31  ;;  %v22_v35 = vld [vmem:[%s496_s1 + $0x50] sm:$0xff]  ;;  %v23_v36 = vld [vmem:[%s496_s1 + $0x58] sm:$0xff]  ;;  %v40_v37 = vld [vmem:[%s496_s1 + $0xe0] sm:$0xff] }
   0xa   :  { %v41_v38 = vld [vmem:[%s496_s1 + $0xe8] sm:$0xff]  ;;  %v321_v39 = vpack.c.bf16 %v23_v36, %v22_v35  ;;  %v24_v41 = vld [vmem:[%s496_s1 + $0x60] sm:$0xff]  ;;  %v42_v43 = vld [vmem:[%s496_s1 + $0xf0] sm:$0xff] }
   0xb   :  { %v324_v40 = vpack.c.bf16 %v41_v38, %v40_v37  ;;  %v25_v42 = vld [vmem:[%s496_s1 + $0x68] sm:$0xff]  ;;  %v43_v44 = vld [vmem:[%s496_s1 + $0xf8] sm:$0xff]  ;;  %v26_v47 = vld [vmem:[%s496_s1 + $0x70] sm:$0xff] }
   0xc   :  { %v327_v45 = vpack.c.bf16 %v25_v42, %v24_v41  ;;  %v330_v46 = vpack.c.bf16 %v43_v44, %v42_v43  ;;  %v27_v48 = vld [vmem:[%s496_s1 + $0x78] sm:$0xff] }
   0xd   :  { %299 = vmatpush3.bf16.xpose.msk.msra.mxu0 %vm359_vm1, %v297_v14  ;;  %v333_v49 = vpack.c.bf16 %v27_v48, %v26_v47 }
   0xe   :  { %302 = vmatprep.subr.msk.bf16.mxu0 %vm359_vm1, %v300_v15 }
  0x15   :  { %305 = vmatpush3.bf16.xpose.msk.msra.mxu0 %vm359_vm1, %v303_v21 }
  0x16   :  { %308 = vmatprep.subr.msk.bf16.mxu0 %vm359_vm1, %v306_v22 }
  0x1d   :  { %311 = vmatpush3.bf16.xpose.msk.msra.mxu0 %vm359_vm1, %v309_v27 }
  0x1e   :  { %314 = vmatprep.subr.msk.bf16.mxu0 %vm359_vm1, %v312_v28 }
  0x25   :  { %317 = vmatpush3.bf16.xpose.msk.msra.mxu0 %vm359_vm1, %v315_v33 }
  0x26   :  { %320 = vmatprep.subr.msk.bf16.mxu0 %vm359_vm1, %v318_v34 }
  0x2d   :  { %323 = vmatpush3.bf16.xpose.msk.msra.mxu0 %vm359_vm1, %v321_v39 }
  0x2e   :  { %326 = vmatprep.subr.msk.bf16.mxu0 %vm359_vm1, %v324_v40 }
  0x35   :  { %329 = vmatpush3.bf16.xpose.msk.msra.mxu0 %vm359_vm1, %v327_v45 }
  0x36   :  { %332 = vmatprep.subr.msk.bf16.mxu0 %vm359_vm1, %v330_v46 }
  0x3d   :  { %335 = vmatpush3.bf16.xpose.msk.msra.mxu0 %vm359_vm1, %v333_v49 }
  0x44   :  { %287 = vmatmul.mubr.msk.f32.vlgmr.msra.gmra.mrb[0].mxu0 %vm44_vm0, %v11_v16 }
 0x117   :  { %v210_v50 = vpop.f32.mrb[0].mxu0 }
 0x118   :  { %215 = vst [vmem:[%s498_s2] sm:$0xff] %v210_v50  ;;  %v212_v51 = vpop.f32.mrb[1].mxu0 }
 0x119   :  { %216 = vst [vmem:[%s498_s2 + $0x8] sm:$0xff] %v212_v51 }

// kernel: fixed_entropy_hard_negative_loss.3
= control target key start
LH: loop header
LB: loop body
LE: loop exit
PB: predicated region body
PF: predicated region fallthrough
CT: control target
= control target key end

     0   :  { %vm26_vm0 = vcmask 130048   ;;  %v461_v1 = vmov 0   ;;  %v20_v4 = vlaneseq  ;;  %v462_v24 = vmov -2.5   ;;  %s579_s0 = inlined_call_operand.vmem [shape: f32[8,16], index: 0, kind: input, shape index: {}]   ;;  %s580_s2 = inlined_call_operand.vmem [shape: s32[8,1], index: 2, kind: input, shape index: {}]   ;;  %s581_s4 = inlined_call_operand.vmem [shape: f32[8,1], index: 4, kind: output, shape index: {1}]   ;;  %s582_s1 = inlined_call_operand.vmem [shape: f32[8,1], index: 1, kind: input, shape index: {}]   ;;  %s583_s5 = inlined_call_operand.vmem [shape: f32[8,1], index: 5, kind: output, shape index: {2}]   ;;  %s584_s3 = inlined_call_operand.vmem [shape: f32[8,1], index: 3, kind: output, shape index: {0}]  }
   0x1   :  { %v17_v0 = vld [vmem:[%s579_s0] sm:$0xff]  ;;  %342 = vset.pattern.permute.xlu0 %v461_v1  ;;  %v463_v41 = vmov -1.25   ;;  %v464_v58 = vmov -0.625   ;;  %vm312_vm15 = vcmask 7168  }
   0x2   :  { %v27_v2 = vsel %vm26_vm0, %v17_v0, -inf  ;;  %v19_v3 = vld [vmem:[%s580_s2] sm:$0xff]  ;;  %v21_v6 = vand.u32 127, %v20_v4 }
   0x3   :  { %28 = vmax.xlane.f32.xlu0 %v27_v2 }
  0x19   :  { %23 = vperm.xlu0 %342, %v19_v3  }
  0x90   :  { %v512_v5 = vpop.xlane.xlu0 %28 }
  0x91   :  { %v30_v7 = vsub.f32 %v17_v0, %v512_v5 }
  0x98   :  { %v24_v8 = vpop.permute.xlu0 %23 }
  0x99   :  { %vm25_vm1 = vcmp.eq.s32.totalorder %v21_v6, %v24_v8 }
  0x9a   :  { %v515_v9 = vsel %vm25_vm1, -1e+30, %v30_v7  ;;  %v517_v10 = vsel %vm25_vm1, %v30_v7, 0.0 }
  0x9b   :  { %v37_v11 = vmul.f32 0.2, %v515_v9 }
  0x9d   :  { %v38_v12 = vmul.f32 1.442695, %v37_v11 }
  0x9f   :  { %343 = vpow2.f32 %v38_v12 }
  0xa9   :  { %v344_v13 = vpop.eup %343 }
  0xaa   :  { %v40_v14 = vsel %vm26_vm0, %v344_v13, 0.0  ;;  %v43_v15 = vmul.f32 %v344_v13, %v37_v11 }
  0xab   :  { %41 = vadd.xlane.f32.xlu1 %v40_v14  ;;  %v465_v14 = vmov -0.3125  }
  0xac   :  { %v44_v16 = vsel %vm26_vm0, %v43_v15, 0.0 }
  0xaf   :  { %45 = vadd.xlane.f32.xlu1 %v44_v16 }
 0x138   :  { %v42_v17 = vpop.xlane.xlu1 %41 }
 0x139   :  { %345 = vlog2.f32 %v42_v17 }
 0x13a   :  { %347 = vrcp.f32 %v42_v17 }
 0x13c   :  { %v46_v21 = vpop.xlane.xlu1 %45 }
 0x143   :  { %v346_v18 = vpop.eup %345 }
 0x144   :  { %v348_v19 = vpop.eup %347  ;;  %v48_v20 = vmul.f32 0.6931472, %v346_v18 }
 0x145   :  { %v50_v22 = vmul.f32 %v348_v19, %v46_v21 }
 0x147   :  { %v51_v23 = vsub.f32 %v48_v20, %v50_v22 }
 0x149   :  { %vm52_vm2 = vcmp.lt.f32.partialorder %v51_v23, 1.3862944 }
 0x14a   :  { %v53_v25 = vsel %vm52_vm2, 2.5, %v462_v24 }
 0x14b   :  { %v54_v26 = vadd.f32 5.0, %v53_v25 }
 0x14d   :  { %349 = vrcp.f32 %v54_v26 }
 0x157   :  { %v350_v27 = vpop.eup %349 }
 0x158   :  { %v56_v28 = vmul.f32 %v350_v27, %v515_v9 }
 0x15a   :  { %v57_v29 = vmul.f32 1.442695, %v56_v28 }
 0x15c   :  { %351 = vpow2.f32 %v57_v29 }
 0x166   :  { %v352_v30 = vpop.eup %351 }
 0x167   :  { %v59_v31 = vsel %vm26_vm0, %v352_v30, 0.0  ;;  %v62_v32 = vmul.f32 %v352_v30, %v56_v28 }
 0x168   :  { %60 = vadd.xlane.f32.xlu1 %v59_v31  ;;  %v466_v31 = vmov -0.15625  }
 0x169   :  { %v63_v33 = vsel %vm26_vm0, %v62_v32, 0.0 }
 0x16c   :  { %64 = vadd.xlane.f32.xlu1 %v63_v33 }
 0x1f5   :  { %v61_v34 = vpop.xlane.xlu1 %60 }
 0x1f6   :  { %353 = vlog2.f32 %v61_v34 }
 0x1f7   :  { %355 = vrcp.f32 %v61_v34 }
 0x1f9   :  { %v65_v38 = vpop.xlane.xlu1 %64 }
 0x200   :  { %v354_v35 = vpop.eup %353 }
 0x201   :  { %v356_v36 = vpop.eup %355  ;;  %v67_v37 = vmul.f32 0.6931472, %v354_v35 }
 0x202   :  { %v69_v39 = vmul.f32 %v356_v36, %v65_v38 }
 0x204   :  { %v70_v40 = vsub.f32 %v67_v37, %v69_v39 }
 0x206   :  { %vm71_vm3 = vcmp.lt.f32.partialorder %v70_v40, 1.3862944 }
 0x207   :  { %v72_v42 = vsel %vm71_vm3, 1.25, %v463_v41 }
 0x208   :  { %v73_v43 = vadd.f32 %v72_v42, %v54_v26 }
 0x20a   :  { %357 = vrcp.f32 %v73_v43 }
 0x214   :  { %v358_v44 = vpop.eup %357 }
 0x215   :  { %v75_v45 = vmul.f32 %v358_v44, %v515_v9 }
 0x217   :  { %v76_v46 = vmul.f32 1.442695, %v75_v45 }
 0x219   :  { %359 = vpow2.f32 %v76_v46 }
 0x223   :  { %v360_v47 = vpop.eup %359 }
 0x224   :  { %v78_v48 = vsel %vm26_vm0, %v360_v47, 0.0  ;;  %v81_v49 = vmul.f32 %v360_v47, %v75_v45 }
 0x225   :  { %79 = vadd.xlane.f32.xlu1 %v78_v48  ;;  %v467_v48 = vmov -0.078125  }
 0x226   :  { %v82_v50 = vsel %vm26_vm0, %v81_v49, 0.0 }
 0x229   :  { %83 = vadd.xlane.f32.xlu1 %v82_v50 }
 0x2b2   :  { %v80_v51 = vpop.xlane.xlu1 %79 }
 0x2b3   :  { %361 = vlog2.f32 %v80_v51 }
 0x2b4   :  { %363 = vrcp.f32 %v80_v51 }
 0x2b6   :  { %v84_v55 = vpop.xlane.xlu1 %83 }
 0x2bd   :  { %v362_v52 = vpop.eup %361 }
 0x2be   :  { %v364_v53 = vpop.eup %363  ;;  %v86_v54 = vmul.f32 0.6931472, %v362_v52 }
 0x2bf   :  { %v88_v56 = vmul.f32 %v364_v53, %v84_v55 }
 0x2c1   :  { %v89_v57 = vsub.f32 %v86_v54, %v88_v56 }
 0x2c3   :  { %vm90_vm4 = vcmp.lt.f32.partialorder %v89_v57, 1.3862944 }
 0x2c4   :  { %v91_v59 = vsel %vm90_vm4, 0.625, %v464_v58 }
 0x2c5   :  { %v92_v60 = vadd.f32 %v91_v59, %v73_v43 }
 0x2c7   :  { %365 = vrcp.f32 %v92_v60 }
 0x2d1   :  { %v366_v61 = vpop.eup %365 }
 0x2d2   :  { %v94_v62 = vmul.f32 %v366_v61, %v515_v9 }
 0x2d4   :  { %v95_v63 = vmul.f32 1.442695, %v94_v62 }
 0x2d6   :  { %367 = vpow2.f32 %v95_v63 }
 0x2e0   :  { %v368_v0 = vpop.eup %367 }
 0x2e1   :  { %v97_v1 = vsel %vm26_vm0, %v368_v0, 0.0  ;;  %v100_v2 = vmul.f32 %v368_v0, %v94_v62 }
 0x2e2   :  { %98 = vadd.xlane.f32.xlu1 %v97_v1  ;;  %v468_v1 = vmov -0.0390625  }
 0x2e3   :  { %v101_v3 = vsel %vm26_vm0, %v100_v2, 0.0 }
 0x2e6   :  { %102 = vadd.xlane.f32.xlu1 %v101_v3 }
 0x36f   :  { %v99_v4 = vpop.xlane.xlu1 %98 }
 0x370   :  { %369 = vlog2.f32 %v99_v4 }
 0x371   :  { %371 = vrcp.f32 %v99_v4 }
 0x373   :  { %v103_v11 = vpop.xlane.xlu1 %102 }
 0x37a   :  { %v370_v6 = vpop.eup %369 }
 0x37b   :  { %v372_v7 = vpop.eup %371  ;;  %v105_v8 = vmul.f32 0.6931472, %v370_v6 }
 0x37c   :  { %v107_v12 = vmul.f32 %v372_v7, %v103_v11 }
 0x37e   :  { %v108_v13 = vsub.f32 %v105_v8, %v107_v12 }
 0x380   :  { %vm109_vm5 = vcmp.lt.f32.partialorder %v108_v13, 1.3862944 }
 0x381   :  { %v110_v15 = vsel %vm109_vm5, 0.3125, %v465_v14 }
 0x382   :  { %v111_v16 = vadd.f32 %v110_v15, %v92_v60 }
 0x384   :  { %373 = vrcp.f32 %v111_v16 }
 0x38e   :  { %v374_v17 = vpop.eup %373 }
 0x38f   :  { %v113_v18 = vmul.f32 %v374_v17, %v515_v9 }
 0x391   :  { %v114_v19 = vmul.f32 1.442695, %v113_v18 }
 0x393   :  { %375 = vpow2.f32 %v114_v19 }
 0x39d   :  { %v376_v20 = vpop.eup %375 }
 0x39e   :  { %v116_v21 = vsel %vm26_vm0, %v376_v20, 0.0  ;;  %v119_v22 = vmul.f32 %v376_v20, %v113_v18 }
 0x39f   :  { %117 = vadd.xlane.f32.xlu1 %v116_v21  ;;  %v469_v21 = vmov -0.01953125  }
 0x3a0   :  { %v120_v23 = vsel %vm26_vm0, %v119_v22, 0.0 }
 0x3a3   :  { %121 = vadd.xlane.f32.xlu1 %v120_v23 }
 0x42c   :  { %v118_v24 = vpop.xlane.xlu1 %117 }
 0x42d   :  { %377 = vlog2.f32 %v118_v24 }
 0x42e   :  { %379 = vrcp.f32 %v118_v24 }
 0x430   :  { %v122_v28 = vpop.xlane.xlu1 %121 }
 0x437   :  { %v378_v25 = vpop.eup %377 }
 0x438   :  { %v380_v26 = vpop.eup %379  ;;  %v124_v27 = vmul.f32 0.6931472, %v378_v25 }
 0x439   :  { %v126_v29 = vmul.f32 %v380_v26, %v122_v28 }
 0x43b   :  { %v127_v30 = vsub.f32 %v124_v27, %v126_v29 }
 0x43d   :  { %vm128_vm6 = vcmp.lt.f32.partialorder %v127_v30, 1.3862944 }
 0x43e   :  { %v129_v32 = vsel %vm128_vm6, 0.15625, %v466_v31 }
 0x43f   :  { %v130_v33 = vadd.f32 %v129_v32, %v111_v16 }
 0x441   :  { %381 = vrcp.f32 %v130_v33 }
 0x44b   :  { %v382_v34 = vpop.eup %381 }
 0x44c   :  { %v132_v35 = vmul.f32 %v382_v34, %v515_v9 }
 0x44e   :  { %v133_v36 = vmul.f32 1.442695, %v132_v35 }
 0x450   :  { %383 = vpow2.f32 %v133_v36 }
 0x45a   :  { %v384_v37 = vpop.eup %383 }
 0x45b   :  { %v135_v38 = vsel %vm26_vm0, %v384_v37, 0.0  ;;  %v138_v39 = vmul.f32 %v384_v37, %v132_v35 }
 0x45c   :  { %136 = vadd.xlane.f32.xlu1 %v135_v38  ;;  %v470_v38 = vmov -0.009765625  }
 0x45d   :  { %v139_v40 = vsel %vm26_vm0, %v138_v39, 0.0 }
 0x460   :  { %140 = vadd.xlane.f32.xlu1 %v139_v40 }
 0x4e9   :  { %v137_v41 = vpop.xlane.xlu1 %136 }
 0x4ea   :  { %385 = vlog2.f32 %v137_v41 }
 0x4eb   :  { %387 = vrcp.f32 %v137_v41 }
 0x4ed   :  { %v141_v45 = vpop.xlane.xlu1 %140 }
 0x4f4   :  { %v386_v42 = vpop.eup %385 }
 0x4f5   :  { %v388_v43 = vpop.eup %387  ;;  %v143_v44 = vmul.f32 0.6931472, %v386_v42 }
 0x4f6   :  { %v145_v46 = vmul.f32 %v388_v43, %v141_v45 }
 0x4f8   :  { %v146_v47 = vsub.f32 %v143_v44, %v145_v46 }
 0x4fa   :  { %vm147_vm7 = vcmp.lt.f32.partialorder %v146_v47, 1.3862944 }
 0x4fb   :  { %v148_v49 = vsel %vm147_vm7, 0.078125, %v467_v48 }
 0x4fc   :  { %v149_v50 = vadd.f32 %v148_v49, %v130_v33 }
 0x4fe   :  { %389 = vrcp.f32 %v149_v50 }
 0x508   :  { %v390_v51 = vpop.eup %389 }
 0x509   :  { %v151_v52 = vmul.f32 %v390_v51, %v515_v9 }
 0x50b   :  { %v152_v53 = vmul.f32 1.442695, %v151_v52 }
 0x50d   :  { %391 = vpow2.f32 %v152_v53 }
 0x517   :  { %v392_v54 = vpop.eup %391 }
 0x518   :  { %v154_v55 = vsel %vm26_vm0, %v392_v54, 0.0  ;;  %v157_v56 = vmul.f32 %v392_v54, %v151_v52 }
 0x519   :  { %155 = vadd.xlane.f32.xlu0 %v154_v55  ;;  %v471_v55 = vmov -0.0048828125  }
 0x51a   :  { %v158_v57 = vsel %vm26_vm0, %v157_v56, 0.0 }
 0x51b   :  { %159 = vadd.xlane.f32.xlu1 %v158_v57 }
 0x5a6   :  { %v156_v58 = vpop.xlane.xlu0 %155 }
 0x5a7   :  { %393 = vlog2.f32 %v156_v58 }
 0x5a8   :  { %395 = vrcp.f32 %v156_v58  ;;  %v160_v61 = vpop.xlane.xlu1 %159 }
 0x5b1   :  { %v394_v59 = vpop.eup %393 }
 0x5b2   :  { %v396_v60 = vpop.eup %395  ;;  %v162_v62 = vmul.f32 0.6931472, %v394_v59 }
 0x5b3   :  { %v164_v63 = vmul.f32 %v396_v60, %v160_v61 }
 0x5b5   :  { %v165_v0 = vsub.f32 %v162_v62, %v164_v63 }
 0x5b7   :  { %vm166_vm8 = vcmp.lt.f32.partialorder %v165_v0, 1.3862944 }
 0x5b8   :  { %v167_v2 = vsel %vm166_vm8, 0.0390625, %v468_v1 }
 0x5b9   :  { %v168_v3 = vadd.f32 %v167_v2, %v149_v50 }
 0x5bb   :  { %397 = vrcp.f32 %v168_v3 }
 0x5c5   :  { %v398_v4 = vpop.eup %397 }
 0x5c6   :  { %v170_v6 = vmul.f32 %v398_v4, %v515_v9 }
 0x5c8   :  { %v171_v7 = vmul.f32 1.442695, %v170_v6 }
 0x5ca   :  { %399 = vpow2.f32 %v171_v7 }
 0x5d4   :  { %v400_v8 = vpop.eup %399 }
 0x5d5   :  { %v173_v11 = vsel %vm26_vm0, %v400_v8, 0.0  ;;  %v176_v12 = vmul.f32 %v400_v8, %v170_v6 }
 0x5d6   :  { %174 = vadd.xlane.f32.xlu1 %v173_v11  ;;  %v472_v11 = vmov -0.0024414063  }
 0x5d7   :  { %v177_v13 = vsel %vm26_vm0, %v176_v12, 0.0 }
 0x5da   :  { %178 = vadd.xlane.f32.xlu1 %v177_v13 }
 0x663   :  { %v175_v14 = vpop.xlane.xlu1 %174 }
 0x664   :  { %401 = vlog2.f32 %v175_v14 }
 0x665   :  { %403 = vrcp.f32 %v175_v14 }
 0x667   :  { %v179_v18 = vpop.xlane.xlu1 %178 }
 0x66e   :  { %v402_v15 = vpop.eup %401 }
 0x66f   :  { %v404_v16 = vpop.eup %403  ;;  %v181_v17 = vmul.f32 0.6931472, %v402_v15 }
 0x670   :  { %v183_v19 = vmul.f32 %v404_v16, %v179_v18 }
 0x672   :  { %v184_v20 = vsub.f32 %v181_v17, %v183_v19 }
 0x674   :  { %vm185_vm9 = vcmp.lt.f32.partialorder %v184_v20, 1.3862944 }
 0x675   :  { %v186_v22 = vsel %vm185_vm9, 0.01953125, %v469_v21 }
 0x676   :  { %v187_v23 = vadd.f32 %v186_v22, %v168_v3 }
 0x678   :  { %405 = vrcp.f32 %v187_v23 }
 0x682   :  { %v406_v24 = vpop.eup %405 }
 0x683   :  { %v189_v25 = vmul.f32 %v406_v24, %v515_v9 }
 0x685   :  { %v190_v26 = vmul.f32 1.442695, %v189_v25 }
 0x687   :  { %407 = vpow2.f32 %v190_v26 }
 0x691   :  { %v408_v27 = vpop.eup %407 }
 0x692   :  { %v192_v28 = vsel %vm26_vm0, %v408_v27, 0.0  ;;  %v195_v29 = vmul.f32 %v408_v27, %v189_v25 }
 0x693   :  { %193 = vadd.xlane.f32.xlu1 %v192_v28  ;;  %v473_v28 = vmov -0.0012207031  }
 0x694   :  { %v196_v30 = vsel %vm26_vm0, %v195_v29, 0.0 }
 0x697   :  { %197 = vadd.xlane.f32.xlu1 %v196_v30 }
 0x720   :  { %v194_v31 = vpop.xlane.xlu1 %193 }
 0x721   :  { %409 = vlog2.f32 %v194_v31 }
 0x722   :  { %411 = vrcp.f32 %v194_v31 }
 0x724   :  { %v198_v35 = vpop.xlane.xlu1 %197 }
 0x72b   :  { %v410_v32 = vpop.eup %409 }
 0x72c   :  { %v412_v33 = vpop.eup %411  ;;  %v200_v34 = vmul.f32 0.6931472, %v410_v32 }
 0x72d   :  { %v202_v36 = vmul.f32 %v412_v33, %v198_v35 }
 0x72f   :  { %v203_v37 = vsub.f32 %v200_v34, %v202_v36 }
 0x731   :  { %vm204_vm10 = vcmp.lt.f32.partialorder %v203_v37, 1.3862944 }
 0x732   :  { %v205_v39 = vsel %vm204_vm10, 0.009765625, %v470_v38  ;;  %v32_v38 = vsel %vm26_vm0, %v517_v10, 0.0  ;;  %v18_v10 = vld [vmem:[%s582_s1] sm:$0xff] }
 0x733   :  { %v206_v40 = vadd.f32 %v205_v39, %v187_v23 }
 0x735   :  { %413 = vrcp.f32 %v206_v40 }
 0x73f   :  { %v414_v41 = vpop.eup %413 }
 0x740   :  { %v208_v42 = vmul.f32 %v414_v41, %v515_v9 }
 0x742   :  { %v209_v43 = vmul.f32 1.442695, %v208_v42 }
 0x744   :  { %415 = vpow2.f32 %v209_v43 }
 0x74e   :  { %v416_v44 = vpop.eup %415 }
 0x74f   :  { %v211_v45 = vsel %vm26_vm0, %v416_v44, 0.0  ;;  %v214_v46 = vmul.f32 %v416_v44, %v208_v42 }
 0x750   :  { %212 = vadd.xlane.f32.xlu1 %v211_v45 }
 0x751   :  { %v215_v47 = vsel %vm26_vm0, %v214_v46, 0.0  ;;  %v474_v46 = vmov -0.00061035156  }
 0x754   :  { %216 = vadd.xlane.f32.xlu1 %v215_v47 }
 0x7dd   :  { %v213_v48 = vpop.xlane.xlu1 %212 }
 0x7de   :  { %417 = vlog2.f32 %v213_v48 }
 0x7df   :  { %419 = vrcp.f32 %v213_v48 }
 0x7e1   :  { %v217_v52 = vpop.xlane.xlu1 %216 }
 0x7e8   :  { %v418_v49 = vpop.eup %417 }
 0x7e9   :  { %v420_v50 = vpop.eup %419  ;;  %v219_v51 = vmul.f32 0.6931472, %v418_v49  ;;  %v303_v49 = vsub.f32 %v18_v10, %v512_v5 }
 0x7ea   :  { %v221_v53 = vmul.f32 %v420_v50, %v217_v52 }
 0x7ec   :  { %v222_v54 = vsub.f32 %v219_v51, %v221_v53 }
 0x7ee   :  { %vm223_vm11 = vcmp.lt.f32.partialorder %v222_v54, 1.3862944 }
 0x7ef   :  { %v224_v56 = vsel %vm223_vm11, 0.0048828125, %v471_v55 }
 0x7f0   :  { %v225_v57 = vadd.f32 %v224_v56, %v206_v40 }
 0x7f2   :  { %421 = vrcp.f32 %v225_v57 }
 0x7fc   :  { %v422_v58 = vpop.eup %421 }
 0x7fd   :  { %v227_v59 = vmul.f32 %v422_v58, %v515_v9 }
 0x7ff   :  { %v228_v60 = vmul.f32 1.442695, %v227_v59 }
 0x801   :  { %423 = vpow2.f32 %v228_v60 }
 0x80b   :  { %v424_v61 = vpop.eup %423 }
 0x80c   :  { %v230_v62 = vsel %vm26_vm0, %v424_v61, 0.0  ;;  %v233_v63 = vmul.f32 %v424_v61, %v227_v59 }
 0x80d   :  { %231 = vadd.xlane.f32.xlu1 %v230_v62 }
 0x80e   :  { %v234_v0 = vsel %vm26_vm0, %v233_v63, 0.0 }
 0x80f   :  { %235 = vadd.xlane.f32.xlu0 %v234_v0 }
 0x89a   :  { %v232_v1 = vpop.xlane.xlu1 %231 }
 0x89b   :  { %425 = vlog2.f32 %v232_v1 }
 0x89c   :  { %427 = vrcp.f32 %v232_v1  ;;  %v236_v4 = vpop.xlane.xlu0 %235 }
 0x8a5   :  { %v426_v2 = vpop.eup %425 }
 0x8a6   :  { %v428_v3 = vpop.eup %427  ;;  %v238_v6 = vmul.f32 0.6931472, %v426_v2 }
 0x8a7   :  { %v240_v7 = vmul.f32 %v428_v3, %v236_v4 }
 0x8a9   :  { %v241_v8 = vsub.f32 %v238_v6, %v240_v7 }
 0x8ab   :  { %vm242_vm12 = vcmp.lt.f32.partialorder %v241_v8, 1.3862944 }
 0x8ac   :  { %v243_v12 = vsel %vm242_vm12, 0.0024414063, %v472_v11 }
 0x8ad   :  { %v244_v13 = vadd.f32 %v243_v12, %v225_v57 }
 0x8af   :  { %429 = vrcp.f32 %v244_v13 }
 0x8b9   :  { %v430_v14 = vpop.eup %429 }
 0x8ba   :  { %v246_v15 = vmul.f32 %v430_v14, %v515_v9 }
 0x8bc   :  { %v247_v16 = vmul.f32 1.442695, %v246_v15 }
 0x8be   :  { %431 = vpow2.f32 %v247_v16 }
 0x8c8   :  { %v432_v17 = vpop.eup %431 }
 0x8c9   :  { %v249_v18 = vsel %vm26_vm0, %v432_v17, 0.0  ;;  %v252_v19 = vmul.f32 %v432_v17, %v246_v15 }
 0x8ca   :  { %250 = vadd.xlane.f32.xlu1 %v249_v18 }
 0x8cb   :  { %v253_v20 = vsel %vm26_vm0, %v252_v19, 0.0 }
 0x8cc   :  { %254 = vadd.xlane.f32.xlu0 %v253_v20 }
 0x957   :  { %v251_v21 = vpop.xlane.xlu1 %250 }
 0x958   :  { %433 = vlog2.f32 %v251_v21 }
 0x959   :  { %435 = vrcp.f32 %v251_v21  ;;  %v255_v24 = vpop.xlane.xlu0 %254 }
 0x962   :  { %v434_v22 = vpop.eup %433 }
 0x963   :  { %v436_v23 = vpop.eup %435  ;;  %v257_v25 = vmul.f32 0.6931472, %v434_v22 }
 0x964   :  { %v259_v26 = vmul.f32 %v436_v23, %v255_v24 }
 0x966   :  { %v260_v27 = vsub.f32 %v257_v25, %v259_v26 }
 0x968   :  { %vm261_vm13 = vcmp.lt.f32.partialorder %v260_v27, 1.3862944 }
 0x969   :  { %v262_v29 = vsel %vm261_vm13, 0.0012207031, %v473_v28 }
 0x96a   :  { %v263_v30 = vadd.f32 %v262_v29, %v244_v13 }
 0x96c   :  { %437 = vrcp.f32 %v263_v30 }
 0x976   :  { %v438_v31 = vpop.eup %437 }
 0x977   :  { %v265_v32 = vmul.f32 %v438_v31, %v515_v9 }
 0x979   :  { %v266_v33 = vmul.f32 1.442695, %v265_v32 }
 0x97b   :  { %439 = vpow2.f32 %v266_v33 }
 0x985   :  { %v440_v34 = vpop.eup %439 }
 0x986   :  { %v268_v35 = vsel %vm26_vm0, %v440_v34, 0.0  ;;  %v271_v36 = vmul.f32 %v440_v34, %v265_v32 }
 0x987   :  { %269 = vadd.xlane.f32.xlu1 %v268_v35 }
 0x988   :  { %v272_v37 = vsel %vm26_vm0, %v271_v36, 0.0 }
 0x989   :  { %273 = vadd.xlane.f32.xlu0 %v272_v37 }
 0x98b   :  { %33 = vadd.xlane.f32.xlu1 %v32_v38 }
 0xa14   :  { %v270_v39 = vpop.xlane.xlu1 %269 }
 0xa15   :  { %441 = vlog2.f32 %v270_v39 }
 0xa16   :  { %443 = vrcp.f32 %v270_v39  ;;  %v274_v42 = vpop.xlane.xlu0 %273 }
 0xa18   :  { %v34_v58 = vpop.xlane.xlu1 %33 }
 0xa1f   :  { %v442_v40 = vpop.eup %441 }
 0xa20   :  { %v444_v41 = vpop.eup %443  ;;  %v276_v43 = vmul.f32 0.6931472, %v442_v40 }
 0xa21   :  { %v278_v44 = vmul.f32 %v444_v41, %v274_v42 }
 0xa23   :  { %v279_v45 = vsub.f32 %v276_v43, %v278_v44 }
 0xa25   :  { %vm280_vm14 = vcmp.lt.f32.partialorder %v279_v45, 1.3862944 }
 0xa26   :  { %v281_v47 = vsel %vm280_vm14, 0.00061035156, %v474_v46 }
 0xa27   :  { %v282_v48 = vadd.f32 %v281_v47, %v263_v30 }
 0xa29   :  { %445 = vrcp.f32 %v282_v48  ;;  %314 = vst.msk [vmem:[%s581_s4] sm:$0xff] %vm312_vm15, %v282_v48 }
 0xa33   :  { %v446_v50 = vpop.eup %445 }
 0xa34   :  { %v284_v51 = vmul.f32 %v446_v50, %v515_v9  ;;  %v304_v52 = vmul.f32 %v446_v50, %v303_v49  ;;  %v299_v59 = vmul.f32 %v446_v50, %v34_v58 }
 0xa36   :  { %v285_v53 = vmul.f32 1.442695, %v284_v51  ;;  %v300_v60 = vmul.f32 1.442695, %v299_v59  ;;  %v305_v61 = vmul.f32 1.442695, %v304_v52 }
 0xa38   :  { %447 = vpow2.f32 %v285_v53 }
 0xa39   :  { %449 = vpow2.f32 %v300_v60 }
 0xa3a   :  { %451 = vpow2.f32 %v305_v61 }
 0xa42   :  { %v448_v54 = vpop.eup %447 }
 0xa43   :  { %v287_v55 = vsel %vm26_vm0, %v448_v54, 0.0  ;;  %v290_v56 = vmul.f32 %v448_v54, %v284_v51  ;;  %v450_v5 = vpop.eup %449 }
 0xa44   :  { %288 = vadd.xlane.f32.xlu0 %v287_v55  ;;  %v452_v63 = vpop.eup %451 }
 0xa45   :  { %v291_v57 = vsel %vm26_vm0, %v290_v56, 0.0 }
 0xa46   :  { %292 = vadd.xlane.f32.xlu1 %v291_v57 }
 0xad1   :  { %v289_v62 = vpop.xlane.xlu0 %288 }
 0xad2   :  { %453 = vlog2.f32 %v289_v62  ;;  %v302_v9 = vadd.f32 %v450_v5, %v289_v62 }
 0xad3   :  { %455 = vrcp.f32 %v289_v62  ;;  %v293_v3 = vpop.xlane.xlu1 %292 }
 0xad4   :  { %457 = vrcp.f32 %v302_v9 }
 0xadc   :  { %v454_v0 = vpop.eup %453 }
 0xadd   :  { %v456_v1 = vpop.eup %455  ;;  %v295_v2 = vmul.f32 0.6931472, %v454_v0 }
 0xade   :  { %v458_v4 = vpop.eup %457  ;;  %v297_v6 = vmul.f32 %v456_v1, %v293_v3 }
 0xadf   :  { %v308_v7 = vmul.f32 %v458_v4, %v452_v63 }
 0xae0   :  { %v298_v8 = vsub.f32 %v295_v2, %v297_v6 }
 0xae1   :  { %v309_v11 = vadd.f32 1e-07, %v308_v7 }
 0xae2   :  { %315 = vst.msk [vmem:[%s583_s5] sm:$0xff] %vm312_vm15, %v298_v8 }
 0xae3   :  { %459 = vlog2.f32 %v309_v11 }
 0xaed   :  { %v460_v12 = vpop.eup %459 }
 0xaee   :  { %v311_v13 = vmul.f32 0.6931472, %v460_v12 }
 0xaf0   :  { %313 = vst.msk [vmem:[%s584_s3] sm:$0xff] %vm312_vm15, %v311_v13 }

</bundles_post_ra>
